<compile_context>
chip_gen: v7x
topology: tpu7x:2x2x1
jax: 0.10.0
libtpu: 0.0.40
codegen_flags: <defaults>
</compile_context>

<pallas_src>
import jax
import jax.numpy as jnp
from jax.experimental import pallas as pl
from jax.experimental.pallas import tpu as pltpu

_LN_EPS = 1e-12


# --------------------------------------------------------------------------- #
# Kernels
# --------------------------------------------------------------------------- #
def _epilogue(h, b_ref, res_ref, g_ref, beta_ref, o_ref):
    """Fused bias + residual + LayerNorm (f32 math, EUP rsqrt), single store."""
    h = h + b_ref[...]                                  # bias (1, H) broadcast
    # TODO(synk): hidden_dropout_prob dropout is identity at inference;
    # training-time dropout (prng + mask) is not implemented.
    h = h + res_ref[...].astype(jnp.float32)            # residual add
    mean = jnp.mean(h, axis=-1, keepdims=True)
    c = h - mean
    var = jnp.mean(c * c, axis=-1, keepdims=True)
    inv = jax.lax.rsqrt(var + _LN_EPS)                  # EUP rsqrt, no VPU divide
    y = c * inv * g_ref[...] + beta_ref[...]
    o_ref[...] = y.astype(o_ref.dtype)


def _bert_output_kernel_resident(x_ref, w_ref, b_ref, res_ref, g_ref, beta_ref,
                                 o_ref):
    """Resident-W path: one (tm, H) tile per grid step, no K axis, no scratch."""
    h = jnp.dot(x_ref[...].astype(jnp.bfloat16), w_ref[...],
                preferred_element_type=jnp.float32)
    _epilogue(h, b_ref, res_ref, g_ref, beta_ref, o_ref)


def _bert_output_kernel_ktiled(x_ref, w_ref, b_ref, res_ref, g_ref, beta_ref,
                               o_ref, acc_ref):
    """Fallback: grid axis 1 walks the intermediate dim, f32 accumulator."""
    k = pl.program_id(1)

    @pl.when(k == 0)
    def _():
        acc_ref[...] = jnp.zeros_like(acc_ref)

    acc_ref[...] += jnp.dot(x_ref[...].astype(jnp.bfloat16), w_ref[...],
                            preferred_element_type=jnp.float32)

    @pl.when(k == pl.num_programs(1) - 1)
    def _():
        _epilogue(acc_ref[...], b_ref, res_ref, g_ref, beta_ref, o_ref)


# --------------------------------------------------------------------------- #
# Wrapper
# --------------------------------------------------------------------------- #
def _cdiv(a, b):
    return -(-a // b)


def _round_up(a, b):
    return _cdiv(a, b) * b


def _vmem_capacity_bytes():
    """Physical VMEM of the local TPU; conservative 64 MiB if unknown."""
    try:
        info = pltpu.get_tpu_info()
        cap = getattr(info, "vmem_capacity_bytes", None)
        if cap:
            return int(cap)
    except Exception:
        pass
    return 64 << 20


def bert_output(hidden_states, input_tensor, w, b, gamma, beta,
                *, tm_max=None, tk_max=2048, force_resident=None):
    """hidden_states: (B, S, I); input_tensor: (B, S, H);
    w: (I, H) (i.e. W^T of nn.Linear); b, gamma, beta: (H,).  Returns (B, S, H).

    MXU operands are bf16 with f32 accumulation (inference precision); the
    LayerNorm epilogue is computed in f32.  Dropout is the identity.
    """
    B, S, I = hidden_states.shape
    H = input_tensor.shape[-1]
    out_dtype = hidden_states.dtype
    M = B * S

    # Flatten tokens; output stays lane-dense (last dim = full hidden size).
    x2 = hidden_states.reshape(M, I)
    res2 = input_tensor.reshape(M, H)

    # ---- per-generation VMEM budget ---------------------------------------
    vmem_cap = _vmem_capacity_bytes()          # 128 MiB v5e/v6e, 64 MiB v7x/TC
    budget = (vmem_cap * 3) // 4               # ~96 MiB / ~48 MiB
    if tm_max is None:
        tm_max = 512 if vmem_cap >= (100 << 20) else 256

    # ---- M tiling (no host-side padding; Pallas clips the partial block) ---
    tm = min(tm_max, _round_up(M, 8))
    if _cdiv(M, tm) < 2 and M > 8:
        # Keep >=2 tiles on the "parallel" axis so both v7x TensorCores work.
        tm = _round_up(_cdiv(M, 2), 8)
    n_m = _cdiv(M, tm)

    # ---- weights / small params (one-off bf16/f32 casts) -------------------
    w_bf = w.astype(jnp.bfloat16)
    b2 = b.reshape(1, H).astype(jnp.float32)
    g2 = gamma.reshape(1, H).astype(jnp.float32)
    beta2 = beta.reshape(1, H).astype(jnp.float32)

    x_bytes = jnp.dtype(x2.dtype).itemsize
    res_bytes = jnp.dtype(res2.dtype).itemsize
    out_bytes = jnp.dtype(out_dtype).itemsize
    small_bytes = 3 * 2 * H * 4                       # bias/gamma/beta buffers

    # Account W as double-buffered even though its constant index map means it
    # is only DMA'd once (the allocation may still be 2x).
    w_resident_bytes = 2 * I * H * 2
    resident = (w_resident_bytes <= budget // 3) if force_resident is None \
        else bool(force_resident)

    if resident:
        # ---- resident-W path: grid over M only ----------------------------
        grid = (n_m,)
        in_specs = [
            pl.BlockSpec((tm, I), lambda m: (m, 0)),      # x (caller dtype)
            pl.BlockSpec((I, H), lambda m: (0, 0)),       # W bf16, resident
            pl.BlockSpec((1, H), lambda m: (0, 0)),       # bias
            pl.BlockSpec((tm, H), lambda m: (m, 0)),      # residual
            pl.BlockSpec((1, H), lambda m: (0, 0)),       # gamma
            pl.BlockSpec((1, H), lambda m: (0, 0)),       # beta
        ]
        out_specs = pl.BlockSpec((tm, H), lambda m: (m, 0))
        scratch_shapes = []
        kernel = _bert_output_kernel_resident
        dims = ("parallel",)
        vmem_bytes = (w_resident_bytes
                      + 2 * tm * I * x_bytes
                      + 2 * tm * H * res_bytes
                      + 2 * tm * H * out_bytes
                      + small_bytes)
        w_hbm_bytes = I * H * 2                           # W read exactly once
    else:
        # ---- K-tiled fallback (very large intermediate dims) ---------------
        tk = I
        for cand in (tk_max, 2048, 1024, 512, 256):
            if cand <= tk_max and cand < I and I % cand == 0:
                tk = cand
                break
        grid = (n_m, I // tk)
        in_specs = [
            pl.BlockSpec((tm, tk), lambda m, k: (m, k)),  # x
            pl.BlockSpec((tk, H), lambda m, k: (k, 0)),   # W bf16
            pl.BlockSpec((1, H), lambda m, k: (0, 0)),    # bias
            pl.BlockSpec((tm, H), lambda m, k: (m, 0)),   # residual
            pl.BlockSpec((1, H), lambda m, k: (0, 0)),    # gamma
            pl.BlockSpec((1, H), lambda m, k: (0, 0)),    # beta
        ]
        out_specs = pl.BlockSpec((tm, H), lambda m, k: (m, 0))
        scratch_shapes = [pltpu.VMEM((tm, H), jnp.float32)]
        kernel = _bert_output_kernel_ktiled
        dims = ("parallel", "arbitrary")
        vmem_bytes = (2 * tm * tk * x_bytes
                      + 2 * tk * H * 2
                      + 2 * tm * H * res_bytes
                      + 2 * tm * H * out_bytes
                      + tm * H * 4                        # f32 accumulator
                      + small_bytes)
        w_hbm_bytes = n_m * I * H * 2                     # W re-streamed / M tile

    vmem_limit = int(max(min(int(vmem_bytes * 1.5), budget), 4 << 20))

    cost = pl.CostEstimate(
        flops=2 * M * I * H,
        transcendentals=M,                                # one rsqrt per row
        bytes_accessed=(M * I * x_bytes + w_hbm_bytes + M * H * res_bytes
                        + 3 * H * 4 + M * H * out_bytes),
    )

    out2 = pl.pallas_call(
        kernel,
        out_shape=jax.ShapeDtypeStruct((M, H), out_dtype),
        grid_spec=pltpu.PrefetchScalarGridSpec(
            num_scalar_prefetch=0,
            grid=grid,
            in_specs=in_specs,
            out_specs=out_specs,
            scratch_shapes=scratch_shapes,
        ),
        compiler_params=pltpu.CompilerParams(
            dimension_semantics=dims,
            vmem_limit_bytes=vmem_limit),
        cost_estimate=cost,
    )(x2, w_bf, b2, res2, g2, beta2)

    return out2.reshape(B, S, H)


# --------------------------------------------------------------------------- #
# Pure-JAX reference
# --------------------------------------------------------------------------- #
def reference(hidden_states, input_tensor, w, b, gamma, beta):
    h = jnp.einsum('bsi,ih->bsh', hidden_states, w) + b
    h = h + input_tensor
    mean = jnp.mean(h, axis=-1, keepdims=True)
    var = jnp.mean((h - mean) ** 2, axis=-1, keepdims=True)
    return (h - mean) / jnp.sqrt(var + _LN_EPS) * gamma + beta


if __name__ == "__main__":
    # Small shapes consistent with the module: hidden_size=64, intermediate=4*64.
    B, S, H, I = 2, 8, 64, 256

    key = jax.random.PRNGKey(0)
    kx, kr, kw, kb, kg, kbt = jax.random.split(key, 6)

    hidden_states = jax.random.normal(kx, (B, S, I), dtype=jnp.float32)
    input_tensor = jax.random.normal(kr, (B, S, H), dtype=jnp.float32)
    # nn.Linear applies x @ W^T; we directly materialize W^T with shape (I, H).
    w = jax.random.normal(kw, (I, H), dtype=jnp.float32) * 0.02
    b = jax.random.normal(kb, (H,), dtype=jnp.float32) * 0.02
    gamma = 1.0 + 0.1 * jax.random.normal(kg, (H,), dtype=jnp.float32)
    beta = 0.1 * jax.random.normal(kbt, (H,), dtype=jnp.float32)

    ref = reference(hidden_states, input_tensor, w, b, gamma, beta)

    # Path 1: resident-W (default; the >=2-M-tile rule gives a 2-tile grid here).
    out_res = bert_output(hidden_states, input_tensor, w, b, gamma, beta)
    out_res = jax.block_until_ready(out_res)
    assert out_res.shape == (B, S, H)
    # bf16 MXU operands with f32 accumulation -> slightly loosened tolerance.
    assert jnp.allclose(out_res, ref, atol=2e-2, rtol=2e-2), \
        "resident-W path mismatch vs reference"

    # Path 2: K-tiled fallback, forced with tiny tiles so both grid axes and the
    # accumulator init/finalize logic are exercised.
    out_kt = bert_output(hidden_states, input_tensor, w, b, gamma, beta,
                         tm_max=8, tk_max=128, force_resident=False)
    out_kt = jax.block_until_ready(out_kt)
    assert out_kt.shape == (B, S, H)
    assert jnp.allclose(out_kt, ref, atol=2e-2, rtol=2e-2), \
        "K-tiled path mismatch vs reference"

    print("KERNEL_OK")
</pallas_src>

<mosaic_0001>
module attributes {stable_mosaic.version = 11 : i64} {
  func.func @_bert_output_kernel_resident(%arg0: i32, %arg1: memref<8x256xf32, #tpu.memory_space<vmem>>, %arg2: memref<256x64xbf16, #tpu.memory_space<vmem>>, %arg3: memref<1x64xf32, #tpu.memory_space<vmem>>, %arg4: memref<8x64xf32, #tpu.memory_space<vmem>>, %arg5: memref<1x64xf32, #tpu.memory_space<vmem>>, %arg6: memref<1x64xf32, #tpu.memory_space<vmem>>, %arg7: memref<8x64xf32, #tpu.memory_space<vmem>>) attributes {dimension_semantics = [#tpu.dimension_semantics<parallel>], iteration_bounds = array<i64: 2>, scalar_prefetch = 0 : i64, scratch_operands = 0 : i64, tpu.core_type = #tpu.core_type<tc>, window_params = [{transform_indices = @transform_0, window_bounds = array<i64: 8, 256>}, {pipeline_mode = #tpu.pipeline_mode<synchronous>, transform_indices = @transform_1, window_bounds = array<i64: 256, 64>}, {pipeline_mode = #tpu.pipeline_mode<synchronous>, transform_indices = @transform_2, window_bounds = array<i64: 1, 64>}, {transform_indices = @transform_3, window_bounds = array<i64: 8, 64>}, {pipeline_mode = #tpu.pipeline_mode<synchronous>, transform_indices = @transform_4, window_bounds = array<i64: 1, 64>}, {pipeline_mode = #tpu.pipeline_mode<synchronous>, transform_indices = @transform_5, window_bounds = array<i64: 1, 64>}, {transform_indices = @transform_6, window_bounds = array<i64: 8, 64>}]} {
    %c0 = arith.constant 0 : index
    %c0_0 = arith.constant 0 : index
    %0 = vector.load %arg1[%c0, %c0_0] : memref<8x256xf32, #tpu.memory_space<vmem>>, vector<8x256xf32>
    %1 = arith.truncf %0 : vector<8x256xf32> to vector<8x256xbf16>
    %c0_1 = arith.constant 0 : index
    %c0_2 = arith.constant 0 : index
    %2 = vector.load %arg2[%c0_1, %c0_2] : memref<256x64xbf16, #tpu.memory_space<vmem>>, vector<256x64xbf16>
    %cst = arith.constant dense<0.000000e+00> : vector<8x64xf32>
    %3 = tpu.matmul %1, %2, %cst {dimension_numbers = #tpu.dot_dimension_numbers<[1], [0], [0], [1], [0, 0, 1, 1], [], []>} : vector<8x256xbf16>, vector<256x64xbf16>, vector<8x64xf32> -> vector<8x64xf32>
    %c0_3 = arith.constant 0 : index
    %c0_4 = arith.constant 0 : index
    %4 = vector.load %arg3[%c0_3, %c0_4] : memref<1x64xf32, #tpu.memory_space<vmem>>, vector<1x64xf32>
    %5 = vector.broadcast %4 : vector<1x64xf32> to vector<8x64xf32>
    %6 = arith.addf %3, %5 : vector<8x64xf32>
    %c0_5 = arith.constant 0 : index
    %c0_6 = arith.constant 0 : index
    %7 = vector.load %arg4[%c0_5, %c0_6] : memref<8x64xf32, #tpu.memory_space<vmem>>, vector<8x64xf32>
    %8 = arith.addf %6, %7 : vector<8x64xf32>
    %cst_7 = arith.constant dense<0.000000e+00> : vector<8xf32>
    %9 = vector.multi_reduction <add>, %8, %cst_7 [1] : vector<8x64xf32> to vector<8xf32>
    %10 = vector.shape_cast %9 : vector<8xf32> to vector<8x1xf32>
    %cst_8 = arith.constant 6.400000e+01 : f32
    %11 = vector.broadcast %cst_8 : f32 to vector<8x1xf32>
    %12 = arith.divf %10, %11 : vector<8x1xf32>
    %13 = vector.broadcast %12 : vector<8x1xf32> to vector<8x64xf32>
    %14 = arith.subf %8, %13 : vector<8x64xf32>
    %15 = arith.mulf %14, %14 : vector<8x64xf32>
    %cst_9 = arith.constant dense<0.000000e+00> : vector<8xf32>
    %16 = vector.multi_reduction <add>, %15, %cst_9 [1] : vector<8x64xf32> to vector<8xf32>
    %17 = vector.shape_cast %16 : vector<8xf32> to vector<8x1xf32>
    %cst_10 = arith.constant 6.400000e+01 : f32
    %18 = vector.broadcast %cst_10 : f32 to vector<8x1xf32>
    %19 = arith.divf %17, %18 : vector<8x1xf32>
    %cst_11 = arith.constant 9.99999996E-13 : f32
    %20 = vector.broadcast %cst_11 : f32 to vector<8x1xf32>
    %21 = arith.addf %19, %20 : vector<8x1xf32>
    %22 = math.rsqrt %21 : vector<8x1xf32>
    %23 = vector.broadcast %22 : vector<8x1xf32> to vector<8x64xf32>
    %24 = arith.mulf %14, %23 : vector<8x64xf32>
    %c0_12 = arith.constant 0 : index
    %c0_13 = arith.constant 0 : index
    %25 = vector.load %arg5[%c0_12, %c0_13] : memref<1x64xf32, #tpu.memory_space<vmem>>, vector<1x64xf32>
    %26 = vector.broadcast %25 : vector<1x64xf32> to vector<8x64xf32>
    %27 = arith.mulf %24, %26 : vector<8x64xf32>
    %c0_14 = arith.constant 0 : index
    %c0_15 = arith.constant 0 : index
    %28 = vector.load %arg6[%c0_14, %c0_15] : memref<1x64xf32, #tpu.memory_space<vmem>>, vector<1x64xf32>
    %29 = vector.broadcast %28 : vector<1x64xf32> to vector<8x64xf32>
    %30 = arith.addf %27, %29 : vector<8x64xf32>
    %c0_16 = arith.constant 0 : index
    %c0_17 = arith.constant 0 : index
    %31 = vector.load %arg7[%c0_16, %c0_17] : memref<8x64xf32, #tpu.memory_space<vmem>>, vector<8x64xf32>
    tpu.vector_store %arg7[%c0_16, %c0_17], %30 {strides = array<i32>} : memref<8x64xf32, #tpu.memory_space<vmem>>, vector<8x64xf32>,
    return
  }
  func.func @transform_0(%arg0: i32) -> (i32, i32) {
    %c0_i32 = arith.constant 0 : i32
    %c0_i32_0 = arith.constant 0 : i32
    return %arg0, %c0_i32 : i32, i32
  }
  func.func @transform_1(%arg0: i32) -> (i32, i32) {
    %c0_i32 = arith.constant 0 : i32
    %c0_i32_0 = arith.constant 0 : i32
    %c0_i32_1 = arith.constant 0 : i32
    return %c0_i32, %c0_i32_0 : i32, i32
  }
  func.func @transform_2(%arg0: i32) -> (i32, i32) {
    %c0_i32 = arith.constant 0 : i32
    %c0_i32_0 = arith.constant 0 : i32
    %c0_i32_1 = arith.constant 0 : i32
    return %c0_i32, %c0_i32_0 : i32, i32
  }
  func.func @transform_3(%arg0: i32) -> (i32, i32) {
    %c0_i32 = arith.constant 0 : i32
    %c0_i32_0 = arith.constant 0 : i32
    return %arg0, %c0_i32 : i32, i32
  }
  func.func @transform_4(%arg0: i32) -> (i32, i32) {
    %c0_i32 = arith.constant 0 : i32
    %c0_i32_0 = arith.constant 0 : i32
    %c0_i32_1 = arith.constant 0 : i32
    return %c0_i32, %c0_i32_0 : i32, i32
  }
  func.func @transform_5(%arg0: i32) -> (i32, i32) {
    %c0_i32 = arith.constant 0 : i32
    %c0_i32_0 = arith.constant 0 : i32
    %c0_i32_1 = arith.constant 0 : i32
    return %c0_i32, %c0_i32_0 : i32, i32
  }
  func.func @transform_6(%arg0: i32) -> (i32, i32) {
    %c0_i32 = arith.constant 0 : i32
    %c0_i32_0 = arith.constant 0 : i32
    return %arg0, %c0_i32 : i32, i32
  }
}

</mosaic_0001>

<bundles_post_ra>
// kernel: tpu_custom_call.1
= control target key start
LH: loop header
LB: loop body
LE: loop exit
PB: predicated region body
PF: predicated region fallthrough
CT: control target
= control target key end

     0   :  { %11 = vsyncpa [#allocation3], 0  ;;  %s944_s0 = inlined_call_operand.vmem [shape: f32[16,256], index: 0, kind: input, shape index: {}]   ;;  %s945_s1 = inlined_call_operand.vmem [shape: bf16[256,64], index: 1, kind: input, shape index: {}]   ;;  %s946_s2 = inlined_call_operand.vmem [shape: f32[1,64], index: 2, kind: input, shape index: {}]   ;;  %s947_s3 = inlined_call_operand.vmem [shape: f32[16,64], index: 3, kind: input, shape index: {}]   ;;  %s948_s4 = inlined_call_operand.vmem [shape: f32[1,64], index: 4, kind: input, shape index: {}]   ;;  %s949_s5 = inlined_call_operand.vmem [shape: f32[1,64], index: 5, kind: input, shape index: {}]   ;;  %s950_s6 = inlined_call_operand.hbm [shape: f32[16,64], index: 6, kind: output, shape index: {}]  }
   0x1   :  { %13 = vsyncpa [#allocation3 + $0x1], 0  ;;  %s777_s21 = smov 0   ;;  %s779_s22 = smov 0  }
   0x2   :  { %s781_s23 = smov 0   ;;  %s783_s24 = smov 0  }
   0x3 LB: > { %s798_s25 = sadd.s32 4294967295, %s739_s24   ;;  %s566_s26 = sadd.s32 4294967294, %s739_s24   ;;  %s739_s24 = sphi %s783_s24, %s956_s24   ;;  %s735_s23 = sphi %s781_s23, %s955_s23   ;;  %s731_s22 = sphi %s779_s22, %s954_s22   ;;  %s727_s21 = sphi %s777_s21, %s953_s21  }
   0x4   : > { %s802_s27 = sadd.s32 1, %s739_s24   ;;  %s162_s28 = sadd.s32 1, %s735_s23 }
   0x5   : > { %s159_s29 = ssub.s32 %s739_s24, %s802_s27  ;;  %p172_p0 = scmp.ne.s32.totalorder %s735_s23, %s731_s22 }
   0x6   : > { %p160_p1 = scmp.eq.s32.totalorder %s159_s29, 0  ;;  %p173_p2 = scmp.eq.s32.totalorder %s798_s25, 1 }
   0x7   : > { %p178_p3 = scmp.ne.s32.totalorder %s731_s22, %s727_s21  ;;  %p179_p4 = scmp.eq.s32.totalorder %s566_s26, 1 }
   0x8   : > { %s813_s30 = scalar_select %p160_p1, %s735_s23, %s162_s28  }
   0x9   : > { %p815_p5 = por %p173_p2, %p172_p0  ;;  %p819_p6 = por %p179_p4, %p178_p3 }
   0xa   : > { %p569_p7 = scmp.ge.s32.totalorder %s739_s24, 1  ;;  %p224_p8 = scmp.lt.s32.totalorder %s739_s24, 3 }
   0xc   : > { %p225_p9 = pnand %p569_p7, %p224_p8 }
   0xd   : > { %v659_v0 = vld [vmem:[%s945_s1 + $0x40] sm:$0xff] (!%p225_p9)   ;;  %v661_v2 = vld [vmem:[%s945_s1 + $0x48] sm:$0xff] (!%p225_p9)   ;;  %p258_p10 = scmp.lt.s32.totalorder (!%p225_p9), %s798_s25, 1  ;;  %v663_v4 = vld [vmem:[%s945_s1 + $0x50] sm:$0xff] (!%p225_p9)   ;;  %vm449_vm0 = vcmask (!%p225_p9), 523264   ;;  %s594_s14 = sshll.u32 (!%p225_p9), %s798_s25, 7 }
   0xe   : > { %228 = sbr.rel (%p225_p9) target bundleno = 592 (0x250), region = 44  ;;  %v660_v1 = vld [vmem:[%s945_s1] sm:$0xff] (!%p225_p9)   ;;  %598 = vmatprep.subr.bf16.mxu0 (!%p225_p9), %v659_v0  ;;  %v662_v3 = vld [vmem:[%s945_s1 + $0x8] sm:$0xff] (!%p225_p9)   ;;  %v664_v5 = vld [vmem:[%s945_s1 + $0x10] sm:$0xff] (!%p225_p9)   ;;  %s901_s26 = scalar_lea.hbm (!%p225_p9), %s950_s6, %s594_s14 }
   0xf   : > { %599 = vmatpush3.bf16.msra.mxu0 (!%p225_p9), %v660_v1  ;;  %v665_v6 = vld [vmem:[%s945_s1 + $0x58] sm:$0xff] (!%p225_p9)   ;;  %v667_v8 = vld [vmem:[%s945_s1 + $0x60] sm:$0xff] (!%p225_p9)   ;;  %v669_v10 = vld [vmem:[%s945_s1 + $0x68] sm:$0xff] (!%p225_p9)  }
  0x10   : > { %600 = vmatprep.subr.bf16.mxu0 (!%p225_p9), %v661_v2  ;;  %v666_v7 = vld [vmem:[%s945_s1 + $0x18] sm:$0xff] (!%p225_p9)   ;;  %v668_v9 = vld [vmem:[%s945_s1 + $0x20] sm:$0xff] (!%p225_p9)   ;;  %v670_v13 = vld [vmem:[%s945_s1 + $0x28] sm:$0xff] (!%p225_p9)  }
  0x11   : > { %v671_v14 = vld [vmem:[%s945_s1 + $0x70] sm:$0xff] (!%p225_p9)   ;;  %v673_v16 = vld [vmem:[%s945_s1 + $0x78] sm:$0xff] (!%p225_p9)   ;;  %v574_v21 = vld [vmem:[%s946_s2] ss:$0 sm:$0xff] (!%p225_p9) }
  0x12   : > { %v672_v15 = vld [vmem:[%s945_s1 + $0x30] sm:$0xff] (!%p225_p9)   ;;  %v674_v17 = vld [vmem:[%s945_s1 + $0x38] sm:$0xff] (!%p225_p9)   ;;  %v591_v39 = vld [vmem:[%s948_s4] ss:$0 sm:$0xff] (!%p225_p9) }
  0x13   : > { %601 = vmatpush3.bf16.msra.mxu0 (!%p225_p9), %v662_v3  ;;  %v592_v41 = vld [vmem:[%s949_s5] ss:$0 sm:$0xff] (!%p225_p9) }
  0x14   : > { %602 = vmatprep.subr.bf16.mxu0 (!%p225_p9), %v663_v4 }
  0x15   : > { %s842_s19 = scalar_select %p258_p10, %s798_s25, 1 }
  0x16   : > { %s741_s25 = smov [#allocation2]  }
  0x17   : > { %s597_s9 = sshll.u32 %s842_s19, 4  ;;  %603 = vmatpush3.bf16.msra.mxu0 %v664_v5  ;;  %s573_s18 = sshll.u32 %s842_s19, 3 }
  0x18   : > { %604 = vmatprep.subr.bf16.mxu0 %v665_v6  ;;  %s262_s16 = scalar_lea.vmem %s944_s0, %s597_s9  ;;  %s266_s28 = scalar_lea.vmem %s947_s3, %s573_s18 }
  0x19   : > { %v269_v11 = vld [vmem:[%s262_s16 + $0x8] sm:$0xff]  ;;  %v268_v18 = vld [vmem:[%s262_s16] sm:$0xff]  ;;  %s255_s19 = sand.u32 1, %s731_s22   ;;  %s681_s9 = sshll.u32 %s741_s25, 4  ;;  %s682_s9 = int_to_ptr.vmem [resolvable:$false] %s681_s9 }
  0x1a   : > { %v271_v12 = vpack.c.bf16 %v269_v11, %v269_v11  ;;  %v270_v19 = vpack.c.bf16 %v268_v18, %v268_v18  ;;  %v447_v26 = vld [vmem:[%s266_s28] sm:$0xff]  ;;  %s570_s16 = sshll.u32 %s255_s19, 3  ;;  %s482_s28 = scalar_lea.sflag [#allocation3], %s255_s19 }
  0x1b   : > { %605 = vmatpush3.bf16.msra.mxu0 %v666_v7  ;;  %s257_s15 = scalar_lea.vmem [#allocation2], %s570_s16  ;;  %s683_s16 = scalar_lea.vmem %s682_s9, 256 }
  0x1c   : > { %606 = vmatprep.subr.bf16.mxu0 %v667_v8  ;;  %439 = vmatprep.mubr.bf16.mxu0 %v271_v12  ;;  %s495_s17 = sshll.u32 %s257_s15, 4  ;;  %s903_s17 = int_to_ptr.vmem [resolvable:$true] %s495_s17 }
  0x1d   : > { %s677_s29 = scalar_lea.vmem %s903_s17, 128  ;;  %p684_p0 = scmp.lt.s32.totalorder %s903_s17, %s682_s9 }
  0x1e   : > { %p678_p11 = scmp.ne.s32.totalorder %s903_s17, %s677_s29  ;;  %p685_p1 = scmp.lt.s32.totalorder %s683_s16, %s677_s29 }
  0x1f   : > { %607 = vmatpush3.bf16.msra.mxu0 %v668_v9 }
  0x20   : > { %608 = vmatprep.subr.bf16.mxu0 %v669_v10  ;;  %p679_p12 = pnand %p678_p11, %p815_p5  ;;  %p686_p2 = por %p685_p1, %p684_p0 }
  0x22   : > { %p680_p13 = pneg %p679_p12 }
  0x23   : > { %609 = vmatpush3.bf16.msra.mxu0 %v670_v13 }
  0x24   : > { %610 = vmatprep.subr.bf16.mxu0 %v671_v14  ;;  %p687_p3 = pnand %p686_p2, %p680_p13 }
  0x27   : > { %611 = vmatpush3.bf16.msra.mxu0 %v672_v15 }
  0x28   : > { %612 = vmatprep.subr.bf16.mxu0 %v673_v16 }
  0x2b   : > { %613 = vmatpush3.bf16.msra.mxu0 %v674_v17 }
  0x2e   : > { %440 = vmatmul.mubr.bf16.vlgmr.msra.gmra.mrb[0].mxu0 %v270_v19 }
 0x101   : > { %v614_v20 = vpop.f32.mrb[0].mxu0 }
 0x102   : > { %v615_v22 = vpop.f32.mrb[1].mxu0 }
 0x103   : > { %v616_v23 = vadd.f32 %v615_v22, %v614_v20  ;;  %v617_v24 = vpop.f32.mrb[2].mxu0 }
 0x104   : > { %v618_v25 = vpop.f32.mrb[3].mxu0 }
 0x105   : > { %v442_v27 = vadd.f32 %v616_v23, %v574_v21 }
 0x107   : > { %v448_v28 = vadd.f32 %v447_v26, %v442_v27 }
 0x109   : > { %v450_v29 = vsel %vm449_vm0, %v448_v28, 0.0 }
 0x10a   : > { %451 = vadd.xlane.f32.xlu0 %v450_v29 }
 0x197   : > { %v452_v30 = vpop.xlane.xlu0 %451 }
 0x198   : > { %v454_v31 = vmul.f32 0.015625, %v452_v30 }
 0x19a   : > { %v455_v32 = vsub.f32 %v448_v28, %v454_v31 }
 0x19c   : > { %v456_v33 = vmul.f32 %v455_v32, %v455_v32 }
 0x19e   : > { %v457_v34 = vsel %vm449_vm0, %v456_v33, 0.0 }
 0x19f   : > { %458 = vadd.xlane.f32.xlu0 %v457_v34 }
 0x22c   : > { %v459_v35 = vpop.xlane.xlu0 %458 }
 0x22d   : > { %v460_v36 = vmul.f32 0.015625, %v459_v35 }
 0x22f   : > { %v461_v37 = vadd.f32 1e-12, %v460_v36 }
 0x231   : > { %675 = vrsqrt.f32 %v461_v37 }
 0x23b   : > { %v676_v38 = vpop.eup %675 }
 0x23c   : > { %v463_v40 = vmul.f32 %v676_v38, %v455_v32 }
 0x23e   : > { %v471_v42 = vmul.f32 %v591_v39, %v463_v40 }
 0x240   : > { %v479_v43 = vadd.f32 %v592_v41, %v471_v42 }
 0x242   : > { %480 = vst.msk [vmem:[%s257_s15] sm:$0xff] %vm449_vm0, %v479_v43 }
 0x243   : > { %690 = shalt.err (!%p687_p3)
}
 0x244   : > { %s691_s19 = scalar_lea.hbm %s901_s26, 128  ;;  %s695_s12 = scalar_lea.hbm %s950_s6, 256 }
 0x245   : > { %p692_p4 = scmp.ne.s32.totalorder %s901_s26, %s691_s19  ;;  %p696_p9 = scmp.lt.u32.totalorder %s901_s26, %s950_s6 }
 0x246   : > { %p697_p10 = scmp.lt.u32.totalorder %s695_s12, %s691_s19  ;;  %p699_p12 = scmp.lt.u32.totalorder %s691_s19, %s901_s26 }
 0x247   : > { %p693_p7 = pnand %p692_p4, %p815_p5 }
 0x248   : > { %p698_p11 = por %p697_p10, %p696_p9 }
 0x249   : > { %p694_p8 = pneg %p693_p7 }
 0x24a   : > { %p700_p13 = por %p699_p12, %p698_p11 }
 0x24c   : > { %p701_p0 = pnand %p700_p13, %p694_p8 }
 0x24e   : > { %704 = shalt.err (!%p701_p0)
}
 0x24f   : > { %620 = dma.vmem_to_hbm [thread:$0]  (%p815_p5), %s903_s17, 128, %s901_s26, %s482_s28  }
 0x250 PF: > { %p626_p1 = scmp.ge.s32.totalorder %s739_s24, 2  ;;  %s507_s15 = sand.u32 1, %s727_s21  }
 0x251   : > { %s508_s18 = scalar_lea.sflag [#allocation3], %s507_s15 }
 0x252   : > { %p623_p2 = pnand %p626_p1, %p819_p6 }
 0x254   : > { %722 = dma.done.wait (!%p623_p2), %s508_s18, 128  }
 0x255   : > { %724 = vsyncadd (!%p623_p2), %s508_s18, 4294967168  ;;  %p16_p3 = scmp.ge.s32.totalorder %s802_s27, 4   ;;  %s953_s21 = smov %s731_s22 }
 0x256   : > { %s954_s22 = smov %s735_s23  ;;  %s955_s23 = smov %s813_s30 }
 0x257   : > { %s956_s24 = smov %s802_s27  ;;  %18 = sbr.rel (!%p16_p3) target bundleno = 3 (0x3), region = 82 }
 0x25e   :  { %513 = vsyncpa [#allocation3], 1 }
 0x25f   :  { %515 = vsyncpa [#allocation3 + $0x1], 1 }

</bundles_post_ra>
